<compile_context>
chip_gen: v6e
topology: v6e:2x2x1
jax: 0.10.0
libtpu: 0.0.40
codegen_flags: <defaults>
</compile_context>

<pallas_src>
import jax
import jax.numpy as jnp
import numpy as np
from jax.experimental import pallas as pl
from jax.experimental.pallas import tpu as pltpu


def _banded_row_weights(w_oihw, W):
    """OIHW (Cout, Cin, 3, 3) -> (3, W*Cin, W*Cout) per-ky banded weights.

    Folds the 3 horizontal taps AND the horizontal zero-padding into the weight,
    so the kernel only needs vertical padding and 3 full-width matmuls.
    """
    Cout, Cin, _, _ = w_oihw.shape
    w_kykx = jnp.transpose(w_oihw, (2, 3, 1, 0))          # (3, 3, Cin, Cout)
    xin = np.arange(W)[:, None]                            # input column
    xout = np.arange(W)[None, :]                           # output column
    mats = []
    for ky in range(3):
        m = jnp.zeros((W, Cin, W, Cout), w_oihw.dtype)
        for kx in range(3):
            # output column xout reads input column xin = xout + kx - 1 (padding=1);
            # out-of-range xin simply has no band entry -> implicit zero padding.
            sel = jnp.asarray(xin == (xout + kx - 1), w_oihw.dtype)       # (W, W)
            m = m + sel[:, None, :, None] * w_kykx[ky, kx][None, :, None, :]
        mats.append(m.reshape(W * Cin, W * Cout))
    return jnp.stack(mats, axis=0)                         # (3, W*Cin, W*Cout)


def make_fused_block_kernel(H, W, Cin, Cout):
    """Fused FixupBasicBlock forward for one image per grid step."""

    def kernel(x_ref, w1_ref, w2_ref, scal_ref, out_ref, xpad, ypad):
        # Fixup scalars from SMEM.
        b1a = scal_ref[0]
        b1b = scal_ref[1]
        b2a = scal_ref[2]
        scale = scal_ref[3]
        b2b = scal_ref[4]

        x = x_ref[0]                                       # (H, W*Cin); read once,
                                                           # reused for the residual.

        # --- conv1 input: vertical zero pad + bias1a (PyTorch pads x + bias1a) ---
        zero_in = jnp.zeros((1, W * Cin), jnp.float32)
        xpad[0:1, :] = zero_in
        xpad[H + 1:H + 2, :] = zero_in
        xpad[1:H + 1, :] = x + b1a

        # --- conv1: 3 lane-aligned row-tap matmuls ---
        acc1 = jnp.zeros((H, W * Cout), jnp.float32)
        for ky in range(3):
            acc1 += jnp.dot(xpad[ky:ky + H, :], w1_ref[ky],
                            preferred_element_type=jnp.float32)
        mid = jnp.maximum(acc1 + b1b, 0.0) + b2a           # relu(conv1 + b1b) + b2a

        # --- conv2 input: vertical zero pad of the intermediate (stays in VMEM) ---
        zero_mid = jnp.zeros((1, W * Cout), jnp.float32)
        ypad[0:1, :] = zero_mid
        ypad[H + 1:H + 2, :] = zero_mid
        ypad[1:H + 1, :] = mid

        # --- conv2 ---
        acc2 = jnp.zeros((H, W * Cout), jnp.float32)
        for ky in range(3):
            acc2 += jnp.dot(ypad[ky:ky + H, :], w2_ref[ky],
                            preferred_element_type=jnp.float32)

        # --- scale, bias2b, residual (identity = original x), final ReLU ---
        out_ref[0] = jnp.maximum(acc2 * scale + b2b + x, 0.0)

    return kernel


def fixup_basic_block_forward(x_nchw, params):
    N, C, H, W = x_nchw.shape
    Cin = C
    Cout = params['conv1_w'].shape[0]
    assert Cout == Cin, "downsample=None requires inplanes == planes"

    # TODO(synk): keep activations in NHWC/row layout across blocks; these two
    # transposes are only here because the PyTorch-facing boundary is NCHW.
    x = jnp.transpose(x_nchw, (0, 2, 3, 1)).astype(jnp.float32)    # NHWC
    x2d = x.reshape(N, H, W * Cin)                                 # (N, H, W*C) rows

    w1 = _banded_row_weights(params['conv1_w'].astype(jnp.float32), W)   # (3, W*Cin, W*Cout)
    w2 = _banded_row_weights(params['conv2_w'].astype(jnp.float32), W)   # (3, W*Cout, W*Cout)

    scalars = jnp.concatenate([params['bias1a'], params['bias1b'],
                               params['bias2a'], params['scale'],
                               params['bias2b']]).astype(jnp.float32)    # (5,) -> SMEM

    # Explicit VMEM budget: double-buffered in/out/weights + the two padded scratches.
    vmem_bytes = 4 * (2 * H * W * Cin + 2 * H * W * Cout
                      + 2 * 3 * (W * Cin) * (W * Cout)
                      + 2 * 3 * (W * Cout) * (W * Cout)
                      + (H + 2) * W * Cin + (H + 2) * W * Cout)
    vmem_limit = int(min(48 * 1024 * 1024, max(2 * vmem_bytes, 1 << 20)))

    out2d = pl.pallas_call(
        make_fused_block_kernel(H, W, Cin, Cout),
        out_shape=jax.ShapeDtypeStruct((N, H, W * Cout), jnp.float32),
        grid=(N,),
        in_specs=[
            pl.BlockSpec((1, H, W * Cin), lambda n: (n, 0, 0)),          # x rows
            pl.BlockSpec((3, W * Cin, W * Cout), lambda n: (0, 0, 0)),   # conv1 banded w
            pl.BlockSpec((3, W * Cout, W * Cout), lambda n: (0, 0, 0)),  # conv2 banded w
            pl.BlockSpec(memory_space=pltpu.MemorySpace.SMEM),           # fixup scalars
        ],
        out_specs=pl.BlockSpec((1, H, W * Cout), lambda n: (n, 0, 0)),
        scratch_shapes=[
            pltpu.VMEM((H + 2, W * Cin), jnp.float32),    # padded conv1 input
            pltpu.VMEM((H + 2, W * Cout), jnp.float32),   # padded conv2 input
        ],
        compiler_params=pltpu.CompilerParams(
            dimension_semantics=("parallel",),            # batch axis -> megacore on v7x
            vmem_limit_bytes=vmem_limit,
        ),
    )(x2d, w1, w2, scalars)

    out = out2d.reshape(N, H, W, Cout)
    return jnp.transpose(out, (0, 3, 1, 2))               # back to NCHW


def ref_forward(x_nchw, params):
    """Pure-JAX reference mirroring the PyTorch forward (NCHW, OIHW)."""
    dn = ('NCHW', 'OIHW', 'NCHW')
    xb = x_nchw + params['bias1a'][0]
    out = jax.lax.conv_general_dilated(xb, params['conv1_w'], (1, 1),
                                       ((1, 1), (1, 1)), dimension_numbers=dn)
    out = jnp.maximum(out + params['bias1b'][0], 0.0)
    out = jax.lax.conv_general_dilated(out + params['bias2a'][0], params['conv2_w'],
                                       (1, 1), ((1, 1), (1, 1)), dimension_numbers=dn)
    out = out * params['scale'][0] + params['bias2b'][0]
    out = out + x_nchw
    return jnp.maximum(out, 0.0)


if __name__ == "__main__":
    key = jax.random.PRNGKey(0)
    kx, k1, k2 = jax.random.split(key, 3)

    N, C, H, W = 2, 4, 16, 16     # inplanes = planes = 4, stride = 1
    planes = 4

    x = jax.random.normal(kx, (N, C, H, W), jnp.float32)
    params = {
        'conv1_w': jax.random.normal(k1, (planes, C, 3, 3), jnp.float32) * 0.1,
        'conv2_w': jax.random.normal(k2, (planes, planes, 3, 3), jnp.float32) * 0.1,
        # Module __init__ uses zeros / ones for the Fixup scalars; deterministic
        # small non-zero values are used here to exercise the broadcast paths.
        'bias1a': jnp.array([0.10], jnp.float32),
        'bias1b': jnp.array([-0.05], jnp.float32),
        'bias2a': jnp.array([0.07], jnp.float32),
        'scale':  jnp.array([1.30], jnp.float32),
        'bias2b': jnp.array([0.02], jnp.float32),
    }

    out = jax.block_until_ready(fixup_basic_block_forward(x, params))
    ref = jax.block_until_ready(ref_forward(x, params))

    assert out.shape == (N, planes, H, W)
    np.testing.assert_allclose(np.asarray(out), np.asarray(ref), rtol=1e-4, atol=1e-4)
    print("KERNEL_OK")
</pallas_src>

<mosaic_0001>
module attributes {stable_mosaic.version = 11 : i64} {
  func.func @kernel(%arg0: i32, %arg1: memref<1x16x64xf32, #tpu.memory_space<vmem>>, %arg2: memref<3x64x64xf32, #tpu.memory_space<vmem>>, %arg3: memref<3x64x64xf32, #tpu.memory_space<vmem>>, %arg4: memref<5xf32, #tpu.memory_space<smem>>, %arg5: memref<1x16x64xf32, #tpu.memory_space<vmem>>, %arg6: memref<18x64xf32, #tpu.memory_space<vmem>>, %arg7: memref<18x64xf32, #tpu.memory_space<vmem>>) attributes {dimension_semantics = [#tpu.dimension_semantics<parallel>], iteration_bounds = array<i64: 2>, scalar_prefetch = 0 : i64, scratch_operands = 2 : i64, tpu.core_type = #tpu.core_type<tc>, window_params = [{transform_indices = @transform_0, window_bounds = array<i64: 1, 16, 64>}, {pipeline_mode = #tpu.pipeline_mode<synchronous>, transform_indices = @transform_1, window_bounds = array<i64: 3, 64, 64>}, {pipeline_mode = #tpu.pipeline_mode<synchronous>, transform_indices = @transform_2, window_bounds = array<i64: 3, 64, 64>}, {transform_indices = @transform_3, window_bounds = array<i64: 5>}, {transform_indices = @transform_4, window_bounds = array<i64: 1, 16, 64>}]} {
    %c0 = arith.constant 0 : index
    %0 = memref.load %arg4[%c0] : memref<5xf32, #tpu.memory_space<smem>>
    %c1 = arith.constant 1 : index
    %1 = memref.load %arg4[%c1] : memref<5xf32, #tpu.memory_space<smem>>
    %c2 = arith.constant 2 : index
    %2 = memref.load %arg4[%c2] : memref<5xf32, #tpu.memory_space<smem>>
    %c3 = arith.constant 3 : index
    %3 = memref.load %arg4[%c3] : memref<5xf32, #tpu.memory_space<smem>>
    %c4 = arith.constant 4 : index
    %4 = memref.load %arg4[%c4] : memref<5xf32, #tpu.memory_space<smem>>
    %c0_0 = arith.constant 0 : index
    %c0_1 = arith.constant 0 : index
    %c0_2 = arith.constant 0 : index
    %5 = vector.load %arg1[%c0_0, %c0_1, %c0_2] : memref<1x16x64xf32, #tpu.memory_space<vmem>>, vector<1x16x64xf32>
    %6 = vector.shape_cast %5 : vector<1x16x64xf32> to vector<16x64xf32>
    %cst = arith.constant 0.000000e+00 : f32
    %7 = vector.broadcast %cst : f32 to vector<1x64xf32>
    %c0_3 = arith.constant 0 : index
    %c0_4 = arith.constant 0 : index
    %8 = vector.load %arg6[%c0_3, %c0_4] : memref<18x64xf32, #tpu.memory_space<vmem>>, vector<1x64xf32>
    tpu.vector_store %arg6[%c0_3, %c0_4], %7 {strides = array<i32>} : memref<18x64xf32, #tpu.memory_space<vmem>>, vector<1x64xf32>,
    %c17 = arith.constant 17 : index
    %c0_5 = arith.constant 0 : index
    %9 = vector.load %arg6[%c17, %c0_5] : memref<18x64xf32, #tpu.memory_space<vmem>>, vector<1x64xf32>
    tpu.vector_store %arg6[%c17, %c0_5], %7 {strides = array<i32>} : memref<18x64xf32, #tpu.memory_space<vmem>>, vector<1x64xf32>,
    %10 = vector.broadcast %0 : f32 to vector<16x64xf32>
    %11 = arith.addf %6, %10 : vector<16x64xf32>
    %c1_6 = arith.constant 1 : index
    %c0_7 = arith.constant 0 : index
    %12 = vector.load %arg6[%c1_6, %c0_7] : memref<18x64xf32, #tpu.memory_space<vmem>>, vector<16x64xf32>
    tpu.vector_store %arg6[%c1_6, %c0_7], %11 {strides = array<i32>} : memref<18x64xf32, #tpu.memory_space<vmem>>, vector<16x64xf32>,
    %cst_8 = arith.constant 0.000000e+00 : f32
    %13 = vector.broadcast %cst_8 : f32 to vector<16x64xf32>
    %c0_9 = arith.constant 0 : index
    %c0_10 = arith.constant 0 : index
    %14 = vector.load %arg6[%c0_9, %c0_10] : memref<18x64xf32, #tpu.memory_space<vmem>>, vector<16x64xf32>
    %c0_11 = arith.constant 0 : index
    %c0_12 = arith.constant 0 : index
    %c0_13 = arith.constant 0 : index
    %15 = vector.load %arg2[%c0_11, %c0_12, %c0_13] : memref<3x64x64xf32, #tpu.memory_space<vmem>>, vector<1x64x64xf32>
    %16 = vector.shape_cast %15 : vector<1x64x64xf32> to vector<64x64xf32>
    %cst_14 = arith.constant dense<0.000000e+00> : vector<16x64xf32>
    %17 = tpu.matmul %14, %16, %cst_14 {dimension_numbers = #tpu.dot_dimension_numbers<[1], [0], [0], [1], [0, 0, 1, 1], [], []>} : vector<16x64xf32>, vector<64x64xf32>, vector<16x64xf32> -> vector<16x64xf32>
    %18 = arith.addf %13, %17 : vector<16x64xf32>
    %c1_15 = arith.constant 1 : index
    %c0_16 = arith.constant 0 : index
    %19 = vector.load %arg6[%c1_15, %c0_16] : memref<18x64xf32, #tpu.memory_space<vmem>>, vector<16x64xf32>
    %c1_17 = arith.constant 1 : index
    %c0_18 = arith.constant 0 : index
    %c0_19 = arith.constant 0 : index
    %20 = vector.load %arg2[%c1_17, %c0_18, %c0_19] : memref<3x64x64xf32, #tpu.memory_space<vmem>>, vector<1x64x64xf32>
    %21 = vector.shape_cast %20 : vector<1x64x64xf32> to vector<64x64xf32>
    %cst_20 = arith.constant dense<0.000000e+00> : vector<16x64xf32>
    %22 = tpu.matmul %19, %21, %cst_20 {dimension_numbers = #tpu.dot_dimension_numbers<[1], [0], [0], [1], [0, 0, 1, 1], [], []>} : vector<16x64xf32>, vector<64x64xf32>, vector<16x64xf32> -> vector<16x64xf32>
    %23 = arith.addf %18, %22 : vector<16x64xf32>
    %c2_21 = arith.constant 2 : index
    %c0_22 = arith.constant 0 : index
    %24 = vector.load %arg6[%c2_21, %c0_22] : memref<18x64xf32, #tpu.memory_space<vmem>>, vector<16x64xf32>
    %c2_23 = arith.constant 2 : index
    %c0_24 = arith.constant 0 : index
    %c0_25 = arith.constant 0 : index
    %25 = vector.load %arg2[%c2_23, %c0_24, %c0_25] : memref<3x64x64xf32, #tpu.memory_space<vmem>>, vector<1x64x64xf32>
    %26 = vector.shape_cast %25 : vector<1x64x64xf32> to vector<64x64xf32>
    %cst_26 = arith.constant dense<0.000000e+00> : vector<16x64xf32>
    %27 = tpu.matmul %24, %26, %cst_26 {dimension_numbers = #tpu.dot_dimension_numbers<[1], [0], [0], [1], [0, 0, 1, 1], [], []>} : vector<16x64xf32>, vector<64x64xf32>, vector<16x64xf32> -> vector<16x64xf32>
    %28 = arith.addf %23, %27 : vector<16x64xf32>
    %29 = vector.broadcast %1 : f32 to vector<16x64xf32>
    %30 = arith.addf %28, %29 : vector<16x64xf32>
    %cst_27 = arith.constant 0.000000e+00 : f32
    %31 = vector.broadcast %cst_27 : f32 to vector<16x64xf32>
    %32 = arith.maximumf %30, %31 : vector<16x64xf32>
    %33 = vector.broadcast %2 : f32 to vector<16x64xf32>
    %34 = arith.addf %32, %33 : vector<16x64xf32>
    %cst_28 = arith.constant 0.000000e+00 : f32
    %35 = vector.broadcast %cst_28 : f32 to vector<1x64xf32>
    %c0_29 = arith.constant 0 : index
    %c0_30 = arith.constant 0 : index
    %36 = vector.load %arg7[%c0_29, %c0_30] : memref<18x64xf32, #tpu.memory_space<vmem>>, vector<1x64xf32>
    tpu.vector_store %arg7[%c0_29, %c0_30], %35 {strides = array<i32>} : memref<18x64xf32, #tpu.memory_space<vmem>>, vector<1x64xf32>,
    %c17_31 = arith.constant 17 : index
    %c0_32 = arith.constant 0 : index
    %37 = vector.load %arg7[%c17_31, %c0_32] : memref<18x64xf32, #tpu.memory_space<vmem>>, vector<1x64xf32>
    tpu.vector_store %arg7[%c17_31, %c0_32], %35 {strides = array<i32>} : memref<18x64xf32, #tpu.memory_space<vmem>>, vector<1x64xf32>,
    %c1_33 = arith.constant 1 : index
    %c0_34 = arith.constant 0 : index
    %38 = vector.load %arg7[%c1_33, %c0_34] : memref<18x64xf32, #tpu.memory_space<vmem>>, vector<16x64xf32>
    tpu.vector_store %arg7[%c1_33, %c0_34], %34 {strides = array<i32>} : memref<18x64xf32, #tpu.memory_space<vmem>>, vector<16x64xf32>,
    %cst_35 = arith.constant 0.000000e+00 : f32
    %39 = vector.broadcast %cst_35 : f32 to vector<16x64xf32>
    %c0_36 = arith.constant 0 : index
    %c0_37 = arith.constant 0 : index
    %40 = vector.load %arg7[%c0_36, %c0_37] : memref<18x64xf32, #tpu.memory_space<vmem>>, vector<16x64xf32>
    %c0_38 = arith.constant 0 : index
    %c0_39 = arith.constant 0 : index
    %c0_40 = arith.constant 0 : index
    %41 = vector.load %arg3[%c0_38, %c0_39, %c0_40] : memref<3x64x64xf32, #tpu.memory_space<vmem>>, vector<1x64x64xf32>
    %42 = vector.shape_cast %41 : vector<1x64x64xf32> to vector<64x64xf32>
    %cst_41 = arith.constant dense<0.000000e+00> : vector<16x64xf32>
    %43 = tpu.matmul %40, %42, %cst_41 {dimension_numbers = #tpu.dot_dimension_numbers<[1], [0], [0], [1], [0, 0, 1, 1], [], []>} : vector<16x64xf32>, vector<64x64xf32>, vector<16x64xf32> -> vector<16x64xf32>
    %44 = arith.addf %39, %43 : vector<16x64xf32>
    %c1_42 = arith.constant 1 : index
    %c0_43 = arith.constant 0 : index
    %45 = vector.load %arg7[%c1_42, %c0_43] : memref<18x64xf32, #tpu.memory_space<vmem>>, vector<16x64xf32>
    %c1_44 = arith.constant 1 : index
    %c0_45 = arith.constant 0 : index
    %c0_46 = arith.constant 0 : index
    %46 = vector.load %arg3[%c1_44, %c0_45, %c0_46] : memref<3x64x64xf32, #tpu.memory_space<vmem>>, vector<1x64x64xf32>
    %47 = vector.shape_cast %46 : vector<1x64x64xf32> to vector<64x64xf32>
    %cst_47 = arith.constant dense<0.000000e+00> : vector<16x64xf32>
    %48 = tpu.matmul %45, %47, %cst_47 {dimension_numbers = #tpu.dot_dimension_numbers<[1], [0], [0], [1], [0, 0, 1, 1], [], []>} : vector<16x64xf32>, vector<64x64xf32>, vector<16x64xf32> -> vector<16x64xf32>
    %49 = arith.addf %44, %48 : vector<16x64xf32>
    %c2_48 = arith.constant 2 : index
    %c0_49 = arith.constant 0 : index
    %50 = vector.load %arg7[%c2_48, %c0_49] : memref<18x64xf32, #tpu.memory_space<vmem>>, vector<16x64xf32>
    %c2_50 = arith.constant 2 : index
    %c0_51 = arith.constant 0 : index
    %c0_52 = arith.constant 0 : index
    %51 = vector.load %arg3[%c2_50, %c0_51, %c0_52] : memref<3x64x64xf32, #tpu.memory_space<vmem>>, vector<1x64x64xf32>
    %52 = vector.shape_cast %51 : vector<1x64x64xf32> to vector<64x64xf32>
    %cst_53 = arith.constant dense<0.000000e+00> : vector<16x64xf32>
    %53 = tpu.matmul %50, %52, %cst_53 {dimension_numbers = #tpu.dot_dimension_numbers<[1], [0], [0], [1], [0, 0, 1, 1], [], []>} : vector<16x64xf32>, vector<64x64xf32>, vector<16x64xf32> -> vector<16x64xf32>
    %54 = arith.addf %49, %53 : vector<16x64xf32>
    %55 = vector.broadcast %3 : f32 to vector<16x64xf32>
    %56 = arith.mulf %54, %55 : vector<16x64xf32>
    %57 = vector.broadcast %4 : f32 to vector<16x64xf32>
    %58 = arith.addf %56, %57 : vector<16x64xf32>
    %59 = arith.addf %58, %6 : vector<16x64xf32>
    %cst_54 = arith.constant 0.000000e+00 : f32
    %60 = vector.broadcast %cst_54 : f32 to vector<16x64xf32>
    %61 = arith.maximumf %59, %60 : vector<16x64xf32>
    %c0_55 = arith.constant 0 : index
    %c0_56 = arith.constant 0 : index
    %c0_57 = arith.constant 0 : index
    %62 = vector.load %arg5[%c0_55, %c0_56, %c0_57] : memref<1x16x64xf32, #tpu.memory_space<vmem>>, vector<1x16x64xf32>
    %63 = vector.shape_cast %62 : vector<1x16x64xf32> to vector<16x64xf32>
    %64 = vector.shape_cast %61 : vector<16x64xf32> to vector<1x16x64xf32>
    tpu.vector_store %arg5[%c0_55, %c0_56, %c0_57], %64 {strides = array<i32>} : memref<1x16x64xf32, #tpu.memory_space<vmem>>, vector<1x16x64xf32>,
    return
  }
  func.func @transform_0(%arg0: i32) -> (i32, i32, i32) {
    %c0_i32 = arith.constant 0 : i32
    %c0_i32_0 = arith.constant 0 : i32
    %c0_i32_1 = arith.constant 0 : i32
    return %arg0, %c0_i32, %c0_i32_0 : i32, i32, i32
  }
  func.func @transform_1(%arg0: i32) -> (i32, i32, i32) {
    %c0_i32 = arith.constant 0 : i32
    %c0_i32_0 = arith.constant 0 : i32
    %c0_i32_1 = arith.constant 0 : i32
    %c0_i32_2 = arith.constant 0 : i32
    return %c0_i32, %c0_i32_0, %c0_i32_1 : i32, i32, i32
  }
  func.func @transform_2(%arg0: i32) -> (i32, i32, i32) {
    %c0_i32 = arith.constant 0 : i32
    %c0_i32_0 = arith.constant 0 : i32
    %c0_i32_1 = arith.constant 0 : i32
    %c0_i32_2 = arith.constant 0 : i32
    return %c0_i32, %c0_i32_0, %c0_i32_1 : i32, i32, i32
  }
  func.func @transform_3(%arg0: i32) -> i32 {
    %c0_i32 = arith.constant 0 : i32
    %c0_i32_0 = arith.constant 0 : i32
    return %c0_i32 : i32
  }
  func.func @transform_4(%arg0: i32) -> (i32, i32, i32) {
    %c0_i32 = arith.constant 0 : i32
    %c0_i32_0 = arith.constant 0 : i32
    %c0_i32_1 = arith.constant 0 : i32
    return %arg0, %c0_i32, %c0_i32_0 : i32, i32, i32
  }
}

</mosaic_0001>

<bundles_post_ra>
// kernel: tpu_custom_call.1
= control target key start
LH: loop header
LB: loop body
LE: loop exit
PB: predicated region body
PF: predicated region fallthrough
CT: control target
= control target key end

     0   :  { %9 = vsyncpa [#allocation5], 0  ;;  %s1722_s0 = inlined_call_operand.hbm [shape: f32[2,16,64], index: 0, kind: input, shape index: {}]   ;;  %s1723_s1 = inlined_call_operand.hbm [shape: f32[3,64,64], index: 1, kind: input, shape index: {}]   ;;  %s1724_s2 = inlined_call_operand.hbm [shape: f32[3,64,64], index: 2, kind: input, shape index: {}]   ;;  %s1725_s3 = inlined_call_operand.vmem [shape: f32[5], index: 3, kind: input, shape index: {}]   ;;  %s1726_s4 = inlined_call_operand.hbm [shape: f32[2,16,64], index: 4, kind: output, shape index: {}]  }
   0x1   :  { %11 = vsyncpa [#allocation5 + $0x1], 0 }
   0x2   :  { %12 = vsyncpa [#allocation9], 0 }
   0x3   :  { %13 = vsyncpa [#allocation7], 0 }
   0x4   :  { %14 = vsyncpa [#allocation6], 0 }
   0x5   :  { %16 = vsyncpa [#allocation6 + $0x1], 0  ;;  %s1469_s15 = smov 0   ;;  %s1471_s16 = smov 0  }
   0x6   :  { %s1473_s17 = smov 0   ;;  %s1475_s18 = smov 0  }
   0x7 LB: > { %s1490_s19 = sadd.s32 4294967295, %s1432_s18   ;;  %s971_s20 = sadd.s32 4294967294, %s1432_s18   ;;  %s1432_s18 = sphi %s1475_s18, %s1749_s18   ;;  %s1428_s17 = sphi %s1473_s17, %s1748_s17   ;;  %s1424_s16 = sphi %s1471_s16, %s1747_s16   ;;  %s1420_s15 = sphi %s1469_s15, %s1746_s15  }
   0x8   : > { %p42_p0 = scmp.ne.s32.totalorder %s1424_s16, %s1420_s15  ;;  %p1727_p1 = scmp.eq.s32.totalorder %s1490_s19, 0 }
   0x9   : > { %p129_p2 = scmp.eq.s32.totalorder %s1490_s19, 1  ;;  %p135_p3 = scmp.eq.s32.totalorder %s971_s20, 1 }
   0xa   : > { %p1499_p4 = por %p1727_p1, %p42_p0  ;;  %p972_p5 = scmp.ge.s32.totalorder %s1432_s18, 1 }
   0xb   : > { %p1504_p6 = por %p135_p3, %p42_p0  ;;  %p142_p7 = scmp.lt.s32.totalorder %s1432_s18, 3 }
   0xc   : > { %s1731_s21 = scalar_select %p1499_p4, 1, 0 }
   0xd   : > { %s1732_s22 = scalar_select %p1504_p6, 1, 0 }
   0xe   : > { %p1509_p8 = pnand %p972_p5, %p142_p7  ;;  %s1434_s24 = smov [#allocation8]  }
   0xf   : > { %s154_s25 = sshll.u32 %s1434_s24, 4  ;;  %s1435_s27 = smov [#allocation10]   ;;  %s155_s25 = int_to_ptr.vmem [resolvable:$true] %s154_s25 }
  0x10   : > { %s1733_s23 = scalar_select %p1509_p8, 1, 0 }
  0x11   : > { %p1199_p9 = pneg %p1509_p8  ;;  %s167_s28 = sshll.u32 %s1435_s27, 4  ;;  %s168_s28 = int_to_ptr.vmem [resolvable:$true] %s167_s28 }
  0x12   : > { %s181_s5 = sshll.u32 %s1725_s3, 4  ;;  %s1276_s6 = scalar_lea.vmem %s155_s25, 3072  ;;  %s1525_s5 = int_to_ptr.vmem [resolvable:$true] %s181_s5 }
  0x13   : > { %p1518_p11 = pnand %p1199_p9, %p1727_p1  ;;  %p1277_p13 = scmp.ne.s32.totalorder %s155_s25, %s1276_s6 }
  0x14   : > { %p1284_p5 = scmp.lt.s32.totalorder %s155_s25, %s155_s25  ;;  %p1285_p7 = scmp.lt.s32.totalorder %s1276_s6, %s1276_s6 }
  0x15   : > { %p1267_p12 = pneg %p1518_p11 }
  0x16   : > { %p1286_p9 = por %p1285_p7, %p1284_p5 }
  0x17   : > { %p1279_p0 = pnand %p1277_p13, %p1267_p12 }
  0x19   : > { %p1280_p3 = pneg %p1279_p0 }
  0x1b   : > { %p1287_p10 = pnand %p1286_p9, %p1280_p3 }
  0x1d   : > { %1290 = shalt.err (!%p1287_p10)
}
  0x1e   : > { %s1436_s7 = smov 128   ;;  %s1437_s8 = smov 8  }
  0x1f   : > { %1202 = dma.hbm_to_vmem [thread:$0]  (!%p1518_p11), %s1723_s1, 3072, %s155_s25, [#allocation9], %s1436_s7, %s1436_s7, %s1437_s8  }
  0x20   : > { %s1302_s11 = scalar_lea.vmem %s168_s28, 3072  ;;  %p1310_p3 = scmp.lt.s32.totalorder %s168_s28, %s168_s28 }
  0x21   : > { %p1303_p13 = scmp.ne.s32.totalorder %s168_s28, %s1302_s11  ;;  %p1311_p10 = scmp.lt.s32.totalorder %s1302_s11, %s1302_s11 }
  0x23   : > { %p1305_p0 = pnand %p1303_p13, %p1267_p12  ;;  %p1312_p7 = por %p1311_p10, %p1310_p3 }
  0x25   : > { %p1306_p5 = pneg %p1305_p0 }
  0x27   : > { %p1313_p9 = pnand %p1312_p7, %p1306_p5 }
  0x29   : > { %1316 = shalt.err (!%p1313_p9)
}
  0x2a   : > { %1205 = dma.hbm_to_vmem [thread:$0]  (!%p1518_p11), %s1724_s2, 3072, %s168_s28, [#allocation9], %s1436_s7, %s1436_s7, %s1437_s8  }
  0x2b   : > { %s1317_s14 = scalar_lea.vmem %s1525_s5, 16  ;;  %p1325_p3 = scmp.lt.s32.totalorder %s1525_s5, %s1525_s5 }
  0x2c   : > { %p1318_p13 = scmp.ne.s32.totalorder %s1525_s5, %s1317_s14  ;;  %p1326_p10 = scmp.lt.s32.totalorder %s1317_s14, %s1317_s14 }
  0x2e   : > { %p1320_p0 = pnand %p1318_p13, %p1267_p12  ;;  %p1327_p7 = por %p1326_p10, %p1325_p3 }
  0x30   : > { %p1321_p5 = pneg %p1320_p0 }
  0x32   : > { %p1328_p9 = pnand %p1327_p7, %p1321_p5 }
  0x34   : > { %1331 = shalt.err (!%p1328_p9)
}
  0x35   : > { %s1438_s20 = smov [#allocation11]   ;;  %s1562_s24 = sadd.s32 1, %s1432_s18  }
  0x36   : > { %1208 = dma.vmem_to_smem (!%p1518_p11), %s1525_s5, 16, %s1438_s20, [#allocation7]  }
  0x37   : > { %s26_s25 = ssub.s32 %s1432_s18, %s1562_s24  ;;  %s29_s27 = sadd.s32 1, %s1428_s17 }
  0x38   : > { %p27_p12 = scmp.eq.s32.totalorder %s26_s25, 0  ;;  %p36_p13 = scmp.ne.s32.totalorder %s1428_s17, %s1424_s16 }
  0x39   : > { %p37_p0 = scmp.eq.s32.totalorder %s1432_s18, 0  ;;  %p1220_p5 = scmp.lt.s32.totalorder %s1432_s18, 2 }
  0x3a   : > { %s1572_s26 = scalar_select %p27_p12, %s1428_s17, %s29_s27  }
  0x3b   : > { %p38_p3 = por %p37_p0, %p36_p13  ;;  %p1576_p10 = por %p129_p2, %p36_p13 }
  0x3c   : > { %s192_s29 = sand.u32 1, %s1428_s17   ;;  %s1007_s30 = sshll.u32 %s1432_s18, 8 }
  0x3d   : > { %s1735_s28 = scalar_select %p1576_p10, 1, 0 }
  0x3e   : > { %s977_s5 = sshll.u32 %s192_s29, 4  ;;  %s1585_s10 = scalar_lea.hbm %s1722_s0, %s1007_s30 }
  0x3f   : > { %s196_s11 = scalar_lea.vmem [#allocation4], %s977_s5  ;;  %p1587_p11 = pnand %p1220_p5, %p38_p3 }
  0x40   : > { %s203_s12 = sshll.u32 %s196_s11, 4  ;;  %s1593_s14 = scalar_lea.sflag [#allocation5], %s192_s29  ;;  %s1591_s12 = int_to_ptr.vmem [resolvable:$true] %s203_s12 }
  0x41   : > { %s1332_s20 = scalar_lea.hbm %s1585_s10, 256  ;;  %p1334_p7 = pneg %p1587_p11 }
  0x42   : > { %p1333_p2 = scmp.ne.s32.totalorder %s1585_s10, %s1332_s20  ;;  %s1337_s30 = scalar_lea.hbm %s1722_s0, 512 }
  0x43   : > { %p1338_p13 = scmp.lt.s32.totalorder %s1585_s10, %s1722_s0  ;;  %p1339_p0 = scmp.lt.s32.totalorder %s1337_s30, %s1332_s20 }
  0x44   : > { %p1335_p9 = pnand %p1334_p7, %p1333_p2 }
  0x45   : > { %p1340_p5 = por %p1339_p0, %p1338_p13 }
  0x46   : > { %p1336_p12 = pneg %p1335_p9 }
  0x48   : > { %p1341_p3 = pnand %p1340_p5, %p1336_p12 }
  0x4a   : > { %1344 = shalt.err (!%p1341_p3)
}
  0x4b   : > { %s1345_s29 = scalar_lea.vmem %s1591_s12, 256  ;;  %s1439_s9 = smov [#allocation4]  }
  0x4c   : > { %p1346_p1 = scmp.ne.s32.totalorder %s1591_s12, %s1345_s29  ;;  %s1350_s11 = sshll.u32 %s1439_s9, 4  ;;  %s1351_s11 = int_to_ptr.vmem [resolvable:$false] %s1350_s11 }
  0x4d   : > { %s1352_s25 = scalar_lea.vmem %s1351_s11, 512  ;;  %p1353_p9 = scmp.lt.s32.totalorder %s1591_s12, %s1351_s11 }
  0x4e   : > { %p1348_p6 = pnand %p1346_p1, %p1334_p7  ;;  %p1354_p10 = scmp.lt.s32.totalorder %s1352_s25, %s1345_s29 }
  0x50   : > { %p1349_p2 = pneg %p1348_p6  ;;  %p1355_p4 = por %p1354_p10, %p1353_p9 }
  0x52   : > { %p1356_p8 = pnand %p1355_p4, %p1349_p2 }
  0x54   : > { %1359 = shalt.err (!%p1356_p8)
}
  0x55   : > { %1212 = dma.hbm_to_vmem [thread:$0]  (!%p1587_p11), %s1585_s10, 256, %s1591_s12, %s1593_s14, %s1436_s7, %s1436_s7, %s1437_s8  }
  0x56   : > { %p1737_p1 = scmp.ne.s32.totalorder %s1733_s23, 0 }
  0x57   : > { %s1620_s20 = sand.u32 (!%p1737_p1), 1, %s1424_s16   ;;  %p1738_p4 = scmp.ne.s32.totalorder (!%p1737_p1), %s1731_s21, 0 }
  0x58   : > { %215 = sbr.rel (%p1737_p1) target bundleno = 585 (0x249), region = 36  ;;  %s981_s27 = sshll.u32 (!%p1737_p1), %s1620_s20, 4 }
  0x59   : > { %s218_s30 = scalar_lea.sflag (!%p1737_p1), [#allocation5], %s1620_s20  ;;  %s1626_s13 = scalar_lea.vmem (!%p1737_p1), [#allocation4], %s981_s27 }
  0x5d   : > { %1403 = dma.done.wait (%p1738_p4), %s218_s30, 256  }
  0x5e   : > { %1405 = vsyncadd (%p1738_p4), %s218_s30, 4294967040  ;;  %p1739_p6 = scmp.eq.s32.totalorder %s1490_s19, 0 }
  0x60   : > { %1407 = dma.done.wait (%p1739_p6), [#allocation9], 6144   ;;  %p1740_p8 = pmov %p1739_p6 }
  0x61   : > { %p1741_p10 = pmov %p1739_p6 }
  0x62   : > { %1409 = vsyncadd (%p1740_p8), [#allocation9], 4294961152 }
  0x63   : > { %1411 = dma.done.wait (%p1741_p10), [#allocation7], 16   ;;  %p1742_p11 = pmov %p1739_p6 }
  0x65   : > { %1413 = vsyncadd (%p1742_p11), [#allocation7], 4294967280 }
  0x66   : > { %238 = sfence }
  0x67   : > { %v295_v0 = vld [vmem:[#allocation8 + $0x78] sm:$0xff]  ;;  %v294_v2 = vld [vmem:[#allocation8 + $0x70] sm:$0xff]  ;;  %s1640_s23 = sld [smem:[#allocation11]]  ;;  %vm266_vm0 = vcmask 516096   ;;  %v293_v4 = vld [vmem:[#allocation8 + $0x68] sm:$0xff]  ;;  %v1440_v6 = vmov 0.0  }
  0x68   : > { %v284_v1 = vld [vmem:[#allocation8 + $0x38] sm:$0xff]  ;;  %1069 = vmatprep.subr.mxu0 %v295_v0  ;;  %v283_v3 = vld [vmem:[#allocation8 + $0x30] sm:$0xff]  ;;  %v282_v5 = vld [vmem:[#allocation8 + $0x28] sm:$0xff]  ;;  %267 = vst.msk [vmem:[#allocation2] sm:$0x1] %vm266_vm0, %v1440_v6  ;;  %vm272_vm1 = vcmask 523264  }
  0x69   : > { %1088 = vmatprep.subr.mxu1 %v284_v1  ;;  %1070 = vmatpush3.msra.mxu0 %v295_v0  ;;  %268 = vst.msk [vmem:[#allocation2 + $0x11] sm:$0x1] %vm266_vm0, %v1440_v6  ;;  %560 = vst.msk [vmem:[#allocation3] sm:$0x1] %vm266_vm0, %v1440_v6  ;;  %v292_v7 = vld [vmem:[#allocation8 + $0x60] sm:$0xff]  ;;  %v1646_v10 = vld [vmem:[%s1626_s13 + $0x8] sm:$0xff] }
  0x6a   : > { %1089 = vmatpush3.msra.mxu1 %v284_v1  ;;  %561 = vst.msk [vmem:[#allocation3 + $0x11] sm:$0x1] %vm266_vm0, %v1440_v6  ;;  %1071 = vmatprep.subr.mxu0 %v294_v2  ;;  %v281_v8 = vld [vmem:[#allocation8 + $0x20] sm:$0xff]  ;;  %v291_v11 = vld [vmem:[#allocation8 + $0x58] sm:$0xff]  ;;  %v290_v16 = vld [vmem:[#allocation8 + $0x50] sm:$0xff]  ;;  %s986_s21 = sld [smem:[#allocation11 + $0x1]] }
  0x6b   : > { %1090 = vmatprep.subr.mxu1 %v283_v3  ;;  %1072 = vmatpush3.msra.mxu0 %v294_v2  ;;  %v1643_v9 = vld [vmem:[%s1626_s13] sm:$0xff]  ;;  %v280_v12 = vld [vmem:[#allocation8 + $0x18] sm:$0xff]  ;;  %v289_v18 = vld [vmem:[#allocation8 + $0x48] sm:$0xff]  ;;  %s987_s7 = sld [smem:[#allocation11 + $0x2]]  ;;  %s1008_s12 = sshll.u32 %s1490_s19, 8 }
  0x6c   : > { %1091 = vmatpush3.msra.mxu1 %v283_v3  ;;  %1073 = vmatprep.subr.mxu0 %v293_v4  ;;  %v279_v17 = vld [vmem:[#allocation8 + $0x10] sm:$0xff]  ;;  %v278_v19 = vld [vmem:[#allocation8 + $0x8] sm:$0xff]  ;;  %v288_v20 = vld [vmem:[#allocation8 + $0x40] sm:$0xff]  ;;  %s988_s8 = sld [smem:[#allocation11 + $0x3]]  ;;  %s258_s14 = scalar_lea.vmem [#allocation12], %s981_s27 }
  0x6d   : > { %1092 = vmatprep.subr.mxu1 %v282_v5  ;;  %1074 = vmatpush3.msra.mxu0 %v293_v4  ;;  %v269_v13 = vstv %s1640_s23  ;;  %v277_v21 = vld [vmem:[#allocation8] sm:$0xff]  ;;  %v468_v22 = vld [vmem:[#allocation8 + $0xb8] sm:$0xff]  ;;  %v467_v27 = vld [vmem:[#allocation8 + $0xb0] sm:$0xff]  ;;  %s989_s10 = sld [smem:[#allocation11 + $0x4]]  ;;  %s867_s5 = sshll.u32 %s258_s14, 4  ;;  %s1677_s5 = int_to_ptr.vmem [resolvable:$true] %s867_s5 }
  0x6e   : > { %1093 = vmatpush3.msra.mxu1 %v282_v5  ;;  %1075 = vmatprep.subr.mxu0 %v292_v7  ;;  %v270_v14 = vadd.f32 %v269_v13, %v1643_v9  ;;  %v271_v15 = vadd.f32 %v269_v13, %v1646_v10  ;;  %v466_v29 = vld [vmem:[#allocation8 + $0xa8] sm:$0xff]  ;;  %v465_v30 = vld [vmem:[#allocation8 + $0xa0] sm:$0xff]  ;;  %v464_v31 = vld [vmem:[#allocation8 + $0x98] sm:$0xff]  ;;  %s1675_s9 = scalar_lea.hbm %s1726_s4, %s1008_s12  ;;  %s854_s19 = scalar_lea.sflag [#allocation6], %s1620_s20 }
  0x6f   : > { %1094 = vmatprep.subr.mxu1 %v281_v8  ;;  %1076 = vmatpush3.msra.mxu0 %v292_v7  ;;  %v463_v32 = vld [vmem:[#allocation8 + $0x90] sm:$0xff]  ;;  %v462_v33 = vld [vmem:[#allocation8 + $0x88] sm:$0xff]  ;;  %v461_v34 = vld [vmem:[#allocation8 + $0x80] sm:$0xff]  ;;  %s1360_s11 = scalar_lea.vmem %s1677_s5, 256  ;;  %p1743_p12 = scmp.ne.s32.totalorder %s1735_s28, 0 }
  0x70   : > { %1095 = vmatpush3.msra.mxu1 %v281_v8  ;;  %1077 = vmatprep.subr.mxu0 %v291_v11  ;;  %273 = vst.msk [vmem:[#allocation2 + $0x1] sm:$0xff] %vm272_vm1, %v270_v14  ;;  %274 = vst.msk [vmem:[#allocation2 + $0x9] sm:$0xff] %vm272_vm1, %v271_v15  ;;  %v584_v36 = vld [vmem:[#allocation10 + $0x78] sm:$0xff]  ;;  %v583_v38 = vld [vmem:[#allocation10 + $0x70] sm:$0xff]  ;;  %v552_v59 = vstv %s986_s21  ;;  %p1361_p7 = scmp.ne.s32.totalorder %s1677_s5, %s1360_s11  ;;  %s1441_s25 = smov [#allocation12]  }
  0x71   : > { %1096 = vmatprep.subr.mxu1 %v280_v12  ;;  %1078 = vmatpush3.msra.mxu0 %v291_v11  ;;  %v573_v37 = vld [vmem:[#allocation10 + $0x38] sm:$0xff]  ;;  %v572_v39 = vld [vmem:[#allocation10 + $0x30] sm:$0xff]  ;;  %v582_v40 = vld [vmem:[#allocation10 + $0x68] sm:$0xff]  ;;  %v557_v1 = vstv %s987_s7  ;;  %s1364_s27 = sshll.u32 %s1441_s25, 4  ;;  %s1365_s27 = int_to_ptr.vmem [resolvable:$false] %s1364_s27 }
  0x72   : > { %1097 = vmatpush3.msra.mxu1 %v280_v12  ;;  %1079 = vmatprep.subr.mxu0 %v290_v16  ;;  %v571_v41 = vld [vmem:[#allocation10 + $0x28] sm:$0xff]  ;;  %v581_v42 = vld [vmem:[#allocation10 + $0x60] sm:$0xff]  ;;  %v580_v44 = vld [vmem:[#allocation10 + $0x58] sm:$0xff]  ;;  %p1362_p13 = pnand %p1361_p7, %p1743_p12  ;;  %s1366_s30 = scalar_lea.vmem %s1365_s27, 512 }
  0x73   : > { %1098 = vmatprep.subr.mxu1 %v279_v17  ;;  %1080 = vmatpush3.msra.mxu0 %v290_v16  ;;  %v570_v43 = vld [vmem:[#allocation10 + $0x20] sm:$0xff]  ;;  %v569_v45 = vld [vmem:[#allocation10 + $0x18] sm:$0xff]  ;;  %v579_v46 = vld [vmem:[#allocation10 + $0x50] sm:$0xff]  ;;  %p1367_p5 = scmp.lt.s32.totalorder %s1677_s5, %s1365_s27  ;;  %p1368_p3 = scmp.lt.s32.totalorder %s1366_s30, %s1360_s11 }
  0x74   : > { %1099 = vmatpush3.msra.mxu1 %v279_v17  ;;  %1081 = vmatprep.subr.mxu0 %v289_v18  ;;  %v568_v47 = vld [vmem:[#allocation10 + $0x10] sm:$0xff]  ;;  %v578_v48 = vld [vmem:[#allocation10 + $0x48] sm:$0xff]  ;;  %v577_v50 = vld [vmem:[#allocation10 + $0x40] sm:$0xff]  ;;  %p1363_p0 = pneg %p1362_p13 }
  0x75   : > { %1100 = vmatprep.subr.mxu1 %v278_v19  ;;  %1082 = vmatpush3.msra.mxu0 %v289_v18  ;;  %v567_v49 = vld [vmem:[#allocation10 + $0x8] sm:$0xff]  ;;  %v566_v51 = vld [vmem:[#allocation10] sm:$0xff]  ;;  %v757_v52 = vld [vmem:[#allocation10 + $0xb8] sm:$0xff]  ;;  %p1369_p2 = por %p1368_p3, %p1367_p5 }
  0x76   : > { %1101 = vmatpush3.msra.mxu1 %v278_v19  ;;  %1083 = vmatprep.subr.mxu0 %v288_v20  ;;  %v756_v13 = vld [vmem:[#allocation10 + $0xb0] sm:$0xff]  ;;  %v755_v15 = vld [vmem:[#allocation10 + $0xa8] sm:$0xff]  ;;  %v754_v16 = vld [vmem:[#allocation10 + $0xa0] sm:$0xff] }
  0x77   : > { %1102 = vmatprep.subr.mxu1 %v277_v21  ;;  %1084 = vmatpush3.msra.mxu0 %v288_v20  ;;  %v285_v23 = vld [vmem:[#allocation2 + $0x1] sm:$0xff]  ;;  %v286_v25 = vld [vmem:[#allocation2 + $0x9] sm:$0xff]  ;;  %v751_v19 = vld [vmem:[#allocation10 + $0x88] sm:$0xff]  ;;  %p1370_p9 = pnand %p1369_p2, %p1363_p0 }
  0x78   : > { %1103 = vmatpush3.msra.mxu1 %v277_v21  ;;  %v275_v24 = vld [vmem:[#allocation2] sm:$0xff]  ;;  %1085 = vmatprep.mubr.msk.f32.mxu0 %vm272_vm1, %v285_v23  ;;  %v276_v26 = vld [vmem:[#allocation2 + $0x8] sm:$0xff]  ;;  %v750_v20 = vld [vmem:[#allocation10 + $0x80] sm:$0xff] }
  0x79   : > { %1104 = vmatprep.mubr.msk.f32.mxu1 %vm272_vm1, %v275_v24  ;;  %v458_v28 = vld [vmem:[#allocation2 + $0x2] sm:$0xff]  ;;  %1107 = vmatprep.subr.mxu0 %v468_v22  ;;  %v459_v35 = vld [vmem:[#allocation2 + $0xa] sm:$0xff] }
  0x7a   : > { %1086 = vmatmul.mubr.msk.f32.vlgmr.msra.gmra.mxu0 %vm272_vm1, %v286_v25  ;;  %1105 = vmatmul.mubr.msk.f32.vlgmr.msra.gmra.mxu1 %vm272_vm1, %v276_v26  ;;  %v753_v17 = vld [vmem:[#allocation10 + $0x98] sm:$0xff]  ;;  %v752_v18 = vld [vmem:[#allocation10 + $0x90] sm:$0xff] }
  0x7b   : > { %1108 = vmatpush3.msra.mxu0 %v468_v22  ;;  %1123 = vmatprep.mubr.msk.f32.mxu0 %vm272_vm1, %v458_v28  ;;  %v841_v28 = vstv %s988_s8 }
  0x7c   : > { %1109 = vmatprep.subr.mxu0 %v467_v27  ;;  %1126 = vmatprep.subr.mxu1 %v584_v36 }
  0x7d   : > { %1110 = vmatpush3.msra.mxu0 %v467_v27  ;;  %1127 = vmatpush3.msra.mxu1 %v584_v36 }
  0x7e   : > { %1111 = vmatprep.subr.mxu0 %v466_v29  ;;  %1128 = vmatprep.subr.mxu1 %v583_v38 }
  0x7f   : > { %1112 = vmatpush3.msra.mxu0 %v466_v29  ;;  %1129 = vmatpush3.msra.mxu1 %v583_v38 }
  0x80   : > { %1113 = vmatprep.subr.mxu0 %v465_v30  ;;  %1130 = vmatprep.subr.mxu1 %v582_v40 }
  0x81   : > { %1114 = vmatpush3.msra.mxu0 %v465_v30  ;;  %1131 = vmatpush3.msra.mxu1 %v582_v40 }
  0x82   : > { %1115 = vmatprep.subr.mxu0 %v464_v31  ;;  %1132 = vmatprep.subr.mxu1 %v581_v42 }
  0x83   : > { %1116 = vmatpush3.msra.mxu0 %v464_v31  ;;  %1133 = vmatpush3.msra.mxu1 %v581_v42  ;;  %v844_v31 = vstv %s989_s10 }
  0x84   : > { %1117 = vmatprep.subr.mxu0 %v463_v32  ;;  %1134 = vmatprep.subr.mxu1 %v580_v44 }
  0x85   : > { %1118 = vmatpush3.msra.mxu0 %v463_v32  ;;  %1135 = vmatpush3.msra.mxu1 %v580_v44 }
  0x86   : > { %1119 = vmatprep.subr.mxu0 %v462_v33  ;;  %1136 = vmatprep.subr.mxu1 %v579_v46 }
  0x87   : > { %1120 = vmatpush3.msra.mxu0 %v462_v33  ;;  %1137 = vmatpush3.msra.mxu1 %v579_v46 }
  0x88   : > { %1121 = vmatprep.subr.mxu0 %v461_v34  ;;  %1138 = vmatprep.subr.mxu1 %v578_v48 }
  0x89   : > { %1122 = vmatpush3.msra.mxu0 %v461_v34  ;;  %1139 = vmatpush3.msra.mxu1 %v578_v48 }
  0x8a   : > { %1124 = vmatmul.mubr.msk.f32.vlgmr.msra.gmra.mxu0 %vm272_vm1, %v459_v35  ;;  %1145 = vmatprep.subr.mxu0 %v573_v37 }
  0x8b   : > { %1146 = vmatpush3.msra.mxu0 %v573_v37  ;;  %1140 = vmatprep.subr.mxu1 %v577_v50 }
  0x8c   : > { %1147 = vmatprep.subr.mxu0 %v572_v39  ;;  %1141 = vmatpush3.msra.mxu1 %v577_v50 }
  0x8d   : > { %1148 = vmatpush3.msra.mxu0 %v572_v39  ;;  %1164 = vmatprep.subr.mxu1 %v757_v52 }
  0x8e   : > { %1149 = vmatprep.subr.mxu0 %v571_v41 }
  0x8f   : > { %1150 = vmatpush3.msra.mxu0 %v571_v41 }
  0x90   : > { %1151 = vmatprep.subr.mxu0 %v570_v43 }
  0x91   : > { %1152 = vmatpush3.msra.mxu0 %v570_v43 }
  0x92   : > { %1153 = vmatprep.subr.mxu0 %v569_v45 }
  0x93   : > { %1154 = vmatpush3.msra.mxu0 %v569_v45 }
  0x94   : > { %1155 = vmatprep.subr.mxu0 %v568_v47 }
  0x95   : > { %1156 = vmatpush3.msra.mxu0 %v568_v47 }
  0x96   : > { %1157 = vmatprep.subr.mxu0 %v567_v49 }
  0x97   : > { %1158 = vmatpush3.msra.mxu0 %v567_v49 }
  0x98   : > { %1159 = vmatprep.subr.mxu0 %v566_v51 }
  0x99   : > { %1160 = vmatpush3.msra.mxu0 %v566_v51 }
 0x13a   : > { %v1087_v53 = vpop.f32.mrf.mxu0  ;;  %v1106_v54 = vpop.f32.mrf.mxu1 }
 0x13b   : > { %v455_v57 = vadd.f32 %v1106_v54, %v1087_v53 }
 0x13c   : > { %v368_v55 = vpop.f32.mrf.mxu0  ;;  %v449_v56 = vpop.f32.mrf.mxu1 }
 0x13d   : > { %v450_v60 = vadd.f32 %v449_v56, %v368_v55 }
 0x14a   : > { %v1125_v58 = vpop.f32.mrf.mxu0 }
 0x14b   : > { %v551_v61 = vadd.f32 %v1125_v58, %v455_v57 }
 0x14c   : > { %v541_v62 = vpop.f32.mrf.mxu0 }
 0x14d   : > { %v554_v63 = vadd.f32 %v552_v59, %v551_v61  ;;  %v550_v0 = vadd.f32 %v541_v62, %v450_v60 }
 0x14f   : > { %v556_v2 = vmax.f32 %v554_v63, 0.0  ;;  %v553_v3 = vadd.f32 %v552_v59, %v550_v0 }
 0x151   : > { %v559_v4 = vadd.f32 %v557_v1, %v556_v2  ;;  %v555_v5 = vmax.f32 %v553_v3, 0.0 }
 0x153   : > { %563 = vst.msk [vmem:[#allocation3 + $0x9] sm:$0xff] %vm272_vm1, %v559_v4  ;;  %v558_v6 = vadd.f32 %v557_v1, %v555_v5 }
 0x155   : > { %562 = vst.msk [vmem:[#allocation3 + $0x1] sm:$0xff] %vm272_vm1, %v558_v6 }
 0x15a   : > { %v575_v12 = vld [vmem:[#allocation3 + $0x9] sm:$0xff] }
 0x15b   : > { %v748_v21 = vld [vmem:[#allocation3 + $0xa] sm:$0xff] }
 0x15c   : > { %v574_v7 = vld [vmem:[#allocation3 + $0x1] sm:$0xff] }
 0x15d   : > { %v564_v8 = vld [vmem:[#allocation3] sm:$0xff]  ;;  %v565_v11 = vld [vmem:[#allocation3 + $0x8] sm:$0xff]  ;;  %1142 = vmatprep.mubr.msk.f32.mxu1 %vm272_vm1, %v574_v7 }
 0x15e   : > { %1161 = vmatprep.mubr.msk.f32.mxu0 %vm272_vm1, %v564_v8  ;;  %1143 = vmatmul.mubr.msk.f32.vlgmr.msra.gmra.mxu1 %vm272_vm1, %v575_v12  ;;  %v747_v14 = vld [vmem:[#allocation3 + $0x2] sm:$0xff] }
 0x15f   : > { %1162 = vmatmul.mubr.msk.f32.vlgmr.msra.gmra.mxu0 %vm272_vm1, %v565_v11  ;;  %1165 = vmatpush3.msra.mxu1 %v757_v52 }
 0x160   : > { %1180 = vmatprep.mubr.msk.f32.mxu1 %vm272_vm1, %v747_v14  ;;  %1166 = vmatprep.subr.mxu1 %v756_v13 }
 0x161   : > { %1167 = vmatpush3.msra.mxu1 %v756_v13 }
 0x162   : > { %1168 = vmatprep.subr.mxu1 %v755_v15 }
 0x163   : > { %1169 = vmatpush3.msra.mxu1 %v755_v15 }
 0x164   : > { %1170 = vmatprep.subr.mxu1 %v754_v16 }
 0x165   : > { %1171 = vmatpush3.msra.mxu1 %v754_v16 }
 0x166   : > { %1172 = vmatprep.subr.mxu1 %v753_v17 }
 0x167   : > { %1173 = vmatpush3.msra.mxu1 %v753_v17 }
 0x168   : > { %1174 = vmatprep.subr.mxu1 %v752_v18 }
 0x169   : > { %1175 = vmatpush3.msra.mxu1 %v752_v18 }
 0x16a   : > { %1176 = vmatprep.subr.mxu1 %v751_v19 }
 0x16b   : > { %1177 = vmatpush3.msra.mxu1 %v751_v19 }
 0x16c   : > { %1178 = vmatprep.subr.mxu1 %v750_v20 }
 0x16d   : > { %1179 = vmatpush3.msra.mxu1 %v750_v20 }
 0x16e   : > { %1181 = vmatmul.mubr.msk.f32.vlgmr.msra.gmra.mxu1 %vm272_vm1, %v748_v21 }
 0x21e   : > { %v1144_v22 = vpop.f32.mrf.mxu1 }
 0x21f   : > { %v1163_v23 = vpop.f32.mrf.mxu0 }
 0x220   : > { %v657_v24 = vpop.f32.mrf.mxu1  ;;  %v744_v26 = vadd.f32 %v1163_v23, %v1144_v22 }
 0x221   : > { %v738_v25 = vpop.f32.mrf.mxu0 }
 0x222   : > { %v739_v29 = vadd.f32 %v738_v25, %v657_v24 }
 0x22e   : > { %v1182_v27 = vpop.f32.mrf.mxu1 }
 0x22f   : > { %v840_v30 = vadd.f32 %v1182_v27, %v744_v26 }
 0x230   : > { %v830_v32 = vpop.f32.mrf.mxu1 }
 0x231   : > { %v843_v33 = vmul.f32 %v841_v28, %v840_v30  ;;  %v839_v34 = vadd.f32 %v830_v32, %v739_v29 }
 0x233   : > { %v846_v35 = vadd.f32 %v844_v31, %v843_v33  ;;  %v842_v36 = vmul.f32 %v841_v28, %v839_v34 }
 0x235   : > { %v848_v37 = vadd.f32 %v846_v35, %v1646_v10  ;;  %v845_v38 = vadd.f32 %v844_v31, %v842_v36 }
 0x237   : > { %v850_v39 = vmax.f32 %v848_v37, 0.0  ;;  %v847_v40 = vadd.f32 %v845_v38, %v1643_v9 }
 0x239   : > { %852 = vst.msk [vmem:[%s258_s14 + $0x8] sm:$0xff] %vm272_vm1, %v850_v39  ;;  %v849_v10 = vmax.f32 %v847_v40, 0.0 }
 0x23b   : > { %851 = vst.msk [vmem:[%s258_s14] sm:$0xff] %vm272_vm1, %v849_v10 }
 0x23c   : > { %1373 = shalt.err (!%p1370_p9)
}
 0x23d   : > { %s1374_s13 = scalar_lea.hbm %s1675_s9, 256  ;;  %s1378_s7 = scalar_lea.hbm %s1726_s4, 512 }
 0x23e   : > { %p1375_p1 = scmp.ne.s32.totalorder %s1675_s9, %s1374_s13  ;;  %p1379_p8 = scmp.lt.s32.totalorder %s1675_s9, %s1726_s4 }
 0x23f   : > { %p1380_p10 = scmp.lt.s32.totalorder %s1378_s7, %s1374_s13 }
 0x240   : > { %p1376_p4 = pnand %p1375_p1, %p1743_p12 }
 0x241   : > { %p1381_p11 = por %p1380_p10, %p1379_p8 }
 0x242   : > { %p1377_p6 = pneg %p1376_p4 }
 0x244   : > { %p1382_p7 = pnand %p1381_p11, %p1377_p6 }
 0x246   : > { %1385 = shalt.err (!%p1382_p7)
}
 0x247   : > { %s1442_s12 = smov 128   ;;  %s1443_s14 = smov 8  }
 0x248   : > { %1197 = dma.vmem_to_hbm [thread:$0]  (%p1743_p12), %s1677_s5, 256, %s1675_s9, %s854_s19, %s1442_s12, %s1442_s12, %s1443_s14  }
 0x249 PF: > { %s882_s6 = sand.u32 1, %s1420_s15   ;;  %p1744_p13 = scmp.ne.s32.totalorder %s1732_s22, 0 }
 0x24a   : > { %p1745_p0 = scmp.ge.s32.totalorder %s1432_s18, 2  ;;  %s883_s29 = scalar_lea.sflag [#allocation6], %s882_s6 }
 0x24c   : > { %p1214_p5 = pnand %p1745_p0, %p1744_p13 }
 0x24e   : > { %p1215_p3 = pneg %p1214_p5 }
 0x250   : > { %1415 = dma.done.wait (%p1215_p3), %s883_s29, 256  }
 0x251   : > { %1417 = vsyncadd (%p1215_p3), %s883_s29, 4294967040  ;;  %p19_p2 = scmp.ge.s32.totalorder %s1562_s24, 4   ;;  %s1746_s15 = smov %s1424_s16 }
 0x252   : > { %s1747_s16 = smov %s1428_s17  ;;  %s1748_s17 = smov %s1572_s26 }
 0x253   : > { %s1749_s18 = smov %s1562_s24  ;;  %21 = sbr.rel (!%p19_p2) target bundleno = 7 (0x7), region = 98 }
 0x258   :  { %888 = vsyncpa [#allocation5], 1 }
 0x259   :  { %890 = vsyncpa [#allocation5 + $0x1], 1 }
 0x25a   :  { %891 = vsyncpa [#allocation9], 1 }
 0x25b   :  { %892 = vsyncpa [#allocation6], 1 }
 0x25c   :  { %894 = vsyncpa [#allocation6 + $0x1], 1 }
 0x25d   :  { %895 = vsyncpa [#allocation7], 1 }
 0x25e   :  { %897 = vsyncpa [#allocation7 + $0x1], 1 }

</bundles_post_ra>
